<compile_context>
chip_gen: v7x
topology: tpu7x:2x2x1
jax: 0.10.0
libtpu: 0.0.40
codegen_flags: <defaults>
</compile_context>

<pallas_src>
import numpy as np
import jax
import jax.numpy as jnp
from jax.experimental import pallas as pl
from jax.experimental.pallas import tpu as pltpu

N_INPUT = 6
N_HIDDEN = 11
N_OUTPUT = 1

# MXU-friendly padded parameter shapes (zero-filled outside the real block).
N_INPUT_PAD = 8         # features: sublanes of the input slab / K of layer 1
N_HIDDEN_PAD = 16       # hidden units, incl. one constant-1 unit for the bias
N_OUT_PAD = 8           # rows of the layer-2 result; row 0 is the real output
_BIAS_UNIT = N_HIDDEN   # index of the constant-1 hidden unit (carries b2)


def _mlp_kernel(w1_ref, b1_ref, w2_ref, x_ref, o_ref):
    """One batch tile: x_ref (8, TB) -> o_ref (1, TB), both lane-dense."""
    # Layer 1 on the MXU: (16, 8) @ (8, TB) -> (16, TB), f32 accumulate.
    h = jnp.dot(w1_ref[...], x_ref[...], preferred_element_type=jnp.float32)
    # Hidden bias (lane-broadcast of a (16, 1) column) + ReLU.
    h = jnp.maximum(h + b1_ref[...], 0.0)
    # Layer 2 on the MXU: (8, 16) @ (16, TB) -> (8, TB).  Row `_BIAS_UNIT` of h
    # is the constant-1 unit, so predict.bias rides inside this matmul; result
    # rows 1..7 are zero padding and are dropped by the row-0 slice below.
    out = jnp.dot(w2_ref[...], h, preferred_element_type=jnp.float32)
    o_ref[...] = out[0:1, :]


def net_forward(x, w1, b1, w2, b2, *, block_b=32768):
    """x: (B, 6) f32 -> (B, 1) f32.  Semantics match the PyTorch module."""
    x = jnp.asarray(x, jnp.float32)
    B = x.shape[0]

    # Batch tile: multiple of 128 lanes, capped so tiny batches are not padded
    # out to the full default tile.  Large batches give >= 2 blocks (megacore).
    block_b = max(128, min(int(block_b), pl.cdiv(B, 128) * 128))
    block_b = pl.cdiv(block_b, 128) * 128
    n_blocks = pl.cdiv(B, block_b)
    b_pad = n_blocks * block_b

    # Lane-dense input slab: features on sublanes (rows 6..7 zero), batch on
    # lanes.  NOTE: this transpose/pad is one extra XLA pass over x; emitting
    # x as (features, batch) upstream would remove it (and ~half the traffic).
    xt = jnp.pad(x.T, ((0, N_INPUT_PAD - N_INPUT), (0, b_pad - B)))

    # Zero-padded MXU-shaped parameters (VMEM-resident for the whole grid).
    w1p = jnp.zeros((N_HIDDEN_PAD, N_INPUT_PAD), jnp.float32)
    w1p = w1p.at[:N_HIDDEN, :N_INPUT].set(jnp.asarray(w1, jnp.float32))
    b1p = jnp.zeros((N_HIDDEN_PAD, 1), jnp.float32)
    b1p = b1p.at[:N_HIDDEN, 0].set(jnp.asarray(b1, jnp.float32).reshape(N_HIDDEN))
    b1p = b1p.at[_BIAS_UNIT, 0].set(1.0)   # constant-1 unit: relu(0*x + 1) == 1
    w2p = jnp.zeros((N_OUT_PAD, N_HIDDEN_PAD), jnp.float32)
    w2p = w2p.at[0, :N_HIDDEN].set(jnp.asarray(w2, jnp.float32).reshape(N_HIDDEN))
    w2p = w2p.at[0, _BIAS_UNIT].set(jnp.asarray(b2, jnp.float32).reshape(N_OUTPUT)[0])

    out_t = pl.pallas_call(
        _mlp_kernel,
        out_shape=jax.ShapeDtypeStruct((1, b_pad), jnp.float32),
        grid=(n_blocks,),
        in_specs=[
            # Tiny weight tiles; constant block index -> fetched once, stay in VMEM.
            pl.BlockSpec((N_HIDDEN_PAD, N_INPUT_PAD), lambda i: (0, 0)),
            pl.BlockSpec((N_HIDDEN_PAD, 1), lambda i: (0, 0)),
            pl.BlockSpec((N_OUT_PAD, N_HIDDEN_PAD), lambda i: (0, 0)),
            # Batch-tiled, lane-dense input slab.
            pl.BlockSpec((N_INPUT_PAD, block_b), lambda i: (0, i)),
        ],
        out_specs=pl.BlockSpec((N_OUTPUT, block_b), lambda i: (0, i)),
        compiler_params=pltpu.CompilerParams(
            dimension_semantics=("parallel",),     # megacore sharding on v7x
            vmem_limit_bytes=32 * 1024 * 1024,     # headroom over v5e's 16 MiB default
        ),
    )(w1p, b1p, w2p, xt)

    # Drop padded batch columns, return in PyTorch (B, 1) layout.
    return out_t[:, :B].T


def reference_forward(x, w1, b1, w2, b2):
    """Float64 NumPy reference of the PyTorch forward pass."""
    x64 = np.asarray(x, np.float64)
    h = np.maximum(x64 @ np.asarray(w1, np.float64).T + np.asarray(b1, np.float64), 0.0)
    return h @ np.asarray(w2, np.float64).T + np.asarray(b2, np.float64)


if __name__ == "__main__":
    key = jax.random.PRNGKey(0)
    kx, k1, kb1, k2, kb2 = jax.random.split(key, 5)

    w1 = jax.random.normal(k1, (N_HIDDEN, N_INPUT), dtype=jnp.float32)   # hidden.weight
    b1 = jax.random.normal(kb1, (N_HIDDEN,), dtype=jnp.float32)          # hidden.bias
    w2 = jax.random.normal(k2, (N_OUTPUT, N_HIDDEN), dtype=jnp.float32)  # predict.weight
    b2 = jax.random.normal(kb2, (N_OUTPUT,), dtype=jnp.float32)          # predict.bias

    # Small batch: single (shrunk) block.
    B = 8
    x = jax.random.normal(kx, (B, N_INPUT), dtype=jnp.float32)
    out = jax.block_until_ready(net_forward(x, w1, b1, w2, b2))
    ref = reference_forward(x, w1, b1, w2, b2)
    np.testing.assert_allclose(np.asarray(out), ref, rtol=2e-5, atol=2e-5)
    assert out.shape == (B, N_OUTPUT)

    # Ragged batch + multi-block grid (block_b=256 -> 4 pipelined grid steps,
    # padded tail) without needing a large array in the self-test.
    B2 = 1000
    x2 = jax.random.normal(kx, (B2, N_INPUT), dtype=jnp.float32)
    out2 = jax.block_until_ready(net_forward(x2, w1, b1, w2, b2, block_b=256))
    ref2 = reference_forward(x2, w1, b1, w2, b2)
    np.testing.assert_allclose(np.asarray(out2), ref2, rtol=2e-5, atol=2e-5)
    assert out2.shape == (B2, N_OUTPUT)

    print("KERNEL_OK")
</pallas_src>

<mosaic_0001>
module attributes {stable_mosaic.version = 11 : i64} {
  func.func @_mlp_kernel(%arg0: i32, %arg1: memref<16x8xf32, #tpu.memory_space<vmem>>, %arg2: memref<16x1xf32, #tpu.memory_space<vmem>>, %arg3: memref<8x16xf32, #tpu.memory_space<vmem>>, %arg4: memref<8x128xf32, #tpu.memory_space<vmem>>, %arg5: memref<1x128xf32, #tpu.memory_space<vmem>>) attributes {dimension_semantics = [#tpu.dimension_semantics<parallel>], iteration_bounds = array<i64: 1>, scalar_prefetch = 0 : i64, scratch_operands = 0 : i64, tpu.core_type = #tpu.core_type<tc>, window_params = [{pipeline_mode = #tpu.pipeline_mode<synchronous>, transform_indices = @transform_0, window_bounds = array<i64: 16, 8>}, {pipeline_mode = #tpu.pipeline_mode<synchronous>, transform_indices = @transform_1, window_bounds = array<i64: 16, 1>}, {pipeline_mode = #tpu.pipeline_mode<synchronous>, transform_indices = @transform_2, window_bounds = array<i64: 8, 16>}, {transform_indices = @transform_3, window_bounds = array<i64: 8, 128>}, {transform_indices = @transform_4, window_bounds = array<i64: 1, 128>}]} {
    %c0 = arith.constant 0 : index
    %c0_0 = arith.constant 0 : index
    %0 = vector.load %arg1[%c0, %c0_0] : memref<16x8xf32, #tpu.memory_space<vmem>>, vector<16x8xf32>
    %c0_1 = arith.constant 0 : index
    %c0_2 = arith.constant 0 : index
    %1 = vector.load %arg4[%c0_1, %c0_2] : memref<8x128xf32, #tpu.memory_space<vmem>>, vector<8x128xf32>
    %cst = arith.constant dense<0.000000e+00> : vector<16x128xf32>
    %2 = tpu.matmul %0, %1, %cst {dimension_numbers = #tpu.dot_dimension_numbers<[1], [0], [0], [1], [0, 0, 1, 1], [], []>} : vector<16x8xf32>, vector<8x128xf32>, vector<16x128xf32> -> vector<16x128xf32>
    %c0_3 = arith.constant 0 : index
    %c0_4 = arith.constant 0 : index
    %3 = vector.load %arg2[%c0_3, %c0_4] : memref<16x1xf32, #tpu.memory_space<vmem>>, vector<16x1xf32>
    %4 = vector.broadcast %3 : vector<16x1xf32> to vector<16x128xf32>
    %5 = arith.addf %2, %4 : vector<16x128xf32>
    %cst_5 = arith.constant 0.000000e+00 : f32
    %6 = vector.broadcast %cst_5 : f32 to vector<16x128xf32>
    %7 = arith.maximumf %5, %6 : vector<16x128xf32>
    %c0_6 = arith.constant 0 : index
    %c0_7 = arith.constant 0 : index
    %8 = vector.load %arg3[%c0_6, %c0_7] : memref<8x16xf32, #tpu.memory_space<vmem>>, vector<8x16xf32>
    %cst_8 = arith.constant dense<0.000000e+00> : vector<8x128xf32>
    %9 = tpu.matmul %8, %7, %cst_8 {dimension_numbers = #tpu.dot_dimension_numbers<[1], [0], [0], [1], [0, 0, 1, 1], [], []>} : vector<8x16xf32>, vector<16x128xf32>, vector<8x128xf32> -> vector<8x128xf32>
    %10 = vector.extract_strided_slice %9 {offsets = [0, 0], sizes = [1, 128], strides = [1, 1]} : vector<8x128xf32> to vector<1x128xf32>
    %c0_9 = arith.constant 0 : index
    %c0_10 = arith.constant 0 : index
    %11 = vector.load %arg5[%c0_9, %c0_10] : memref<1x128xf32, #tpu.memory_space<vmem>>, vector<1x128xf32>
    tpu.vector_store %arg5[%c0_9, %c0_10], %10 {strides = array<i32>} : memref<1x128xf32, #tpu.memory_space<vmem>>, vector<1x128xf32>,
    return
  }
  func.func @transform_0(%arg0: i32) -> (i32, i32) {
    %c0_i32 = arith.constant 0 : i32
    %c0_i32_0 = arith.constant 0 : i32
    %c0_i32_1 = arith.constant 0 : i32
    return %c0_i32, %c0_i32_0 : i32, i32
  }
  func.func @transform_1(%arg0: i32) -> (i32, i32) {
    %c0_i32 = arith.constant 0 : i32
    %c0_i32_0 = arith.constant 0 : i32
    %c0_i32_1 = arith.constant 0 : i32
    return %c0_i32, %c0_i32_0 : i32, i32
  }
  func.func @transform_2(%arg0: i32) -> (i32, i32) {
    %c0_i32 = arith.constant 0 : i32
    %c0_i32_0 = arith.constant 0 : i32
    %c0_i32_1 = arith.constant 0 : i32
    return %c0_i32, %c0_i32_0 : i32, i32
  }
  func.func @transform_3(%arg0: i32) -> (i32, i32) {
    %c0_i32 = arith.constant 0 : i32
    %c0_i32_0 = arith.constant 0 : i32
    return %c0_i32, %arg0 : i32, i32
  }
  func.func @transform_4(%arg0: i32) -> (i32, i32) {
    %c0_i32 = arith.constant 0 : i32
    %c0_i32_0 = arith.constant 0 : i32
    return %c0_i32, %arg0 : i32, i32
  }
}

</mosaic_0001>

<bundles_post_ra>
// kernel: tpu_custom_call.1
= control target key start
LH: loop header
LB: loop body
LE: loop exit
PB: predicated region body
PF: predicated region fallthrough
CT: control target
= control target key end

     0   :  { %vm33_vm0 = vcmask 64512   ;;  %s321_s0 = inlined_call_operand.vmem [shape: f32[16,8], index: 0, kind: input, shape index: {}]   ;;  %s322_s1 = inlined_call_operand.vmem [shape: f32[16,1], index: 1, kind: input, shape index: {}]   ;;  %s323_s2 = inlined_call_operand.vmem [shape: f32[8,16], index: 2, kind: input, shape index: {}]   ;;  %s324_s3 = inlined_call_operand.vmem [shape: f32[8,128], index: 3, kind: input, shape index: {}]   ;;  %s325_s4 = inlined_call_operand.hbm [shape: f32[1,128], index: 4, kind: output, shape index: {}]  }
   0x1   :  { %v20_v0 = vld [vmem:[%s324_s3] sm:$0xff]  ;;  %v19_v2 = vld [vmem:[%s321_s0 + $0x8] sm:$0xff] }
   0x2   :  { %v18_v1 = vld [vmem:[%s321_s0] sm:$0xff]  ;;  %216 = vmatprep.subr.mxu0 %v20_v0 }
   0x3   :  { %218 = vmatprep.mubr.msk.f32.mxu0 %vm33_vm0, %v18_v1  ;;  %v21_v3 = vld [vmem:[%s322_s1] sm:$0xff] }
   0x4   :  { %9 = vsyncpa [#allocation3], 0  ;;  %217 = vmatpush3.msra.mxu0 %v20_v0  ;;  %v261_v4 = vmov 0   ;;  %v22_v5 = vld [vmem:[%s322_s1 + $0x8] sm:$0xff]  ;;  %v262_v6 = vmov 0.0|0.0   ;;  %vm263_vm1 = vmmov 0  }
   0x5   :  { %236 = vset.pattern.permute.xlu0 %v261_v4  ;;  %219 = vmatmul.mubr.msk.f32.vlgmr.msra.gmra.mrb[0].mxu0 %vm33_vm0, %v19_v2  ;;  %v264_v7 = vmov 0.0   ;;  %v117_v17 = vld [vmem:[%s323_s2] sm:$0xff]  ;;  %vm118_vm2 = vcmask 130048   ;;  %s265_s1 = smov [#allocation2]  }
   0x6   :  { %25 = vperm.xlu0 %236, %v21_v3   ;;  %228 = vmatprep.subr.bf16.mxu1 %v262_v6  ;;  %s199_s25 = sshll.u32 %s265_s1, 4  ;;  %s200_s25 = int_to_ptr.vmem [resolvable:$true] %s199_s25 }
   0x7   :  { %225 = vmatprep.mubr.msk.f32.mxu1 %vm263_vm1, %v264_v7  ;;  %s237_s26 = scalar_lea.vmem %s200_s25, 16  ;;  %s241_s27 = scalar_lea.vmem %s200_s25, 32 }
   0x8   :  { %p238_p0 = scmp.ne.s32.totalorder %s200_s25, %s237_s26  ;;  %p242_p1 = scmp.lt.s32.totalorder %s200_s25, %s200_s25 }
   0x9   :  { %p243_p2 = scmp.lt.s32.totalorder %s241_s27, %s237_s26 }
   0xa   :  { %30 = vperm.xlu0 %236, %v22_v5  }
   0xb   :  { %p244_p3 = por %p243_p2, %p242_p1 }
   0xd   :  { %p245_p4 = pnand %p244_p3, %p238_p0 }
  0x85   :  { %v26_v8 = vpop.permute.xlu0 %25 }
  0x89   :  { %v31_v9 = vpop.permute.xlu0 %30 }
  0xd8   :  { %v220_v10 = vpop.f32.mrb[0].mxu0 }
  0xd9   :  { %v112_v11 = vadd.f32 %v220_v10, %v31_v9  ;;  %v106_v12 = vpop.f32.mrb[1].mxu0 }
  0xda   :  { %v107_v13 = vadd.f32 %v106_v12, %v26_v8 }
  0xdb   :  { %v116_v14 = vmax.f32 %v112_v11, 0.0 }
  0xdc   :  { %v115_v15 = vmax.f32 %v107_v13, 0.0 }
  0xde   :  { %v229_v16 = vpack.c.bf16 %v116_v14, %v115_v15 }
  0xe0   :  { %230 = vmatpush3.bf16.msra.mxu1 %v229_v16 }
  0xe3   :  { %226 = vmatmul.mubr.msk.f32.vlgmr.msra.gmra.mrb[0].mxu1 %vm118_vm2, %v117_v17 }
 0x1b6   :  { %v188_v18 = vpop.f32.mrb[0].mxu1 }
 0x1b7   :  { %192 = vst [vmem:[#allocation2] sm:$0x1] %v188_v18  ;;  %v227_v19 = vpop.f32.mrb[1].mxu1 }
 0x1b8   :  { %248 = shalt.err (!%p245_p4)
}
 0x1b9   :  { %s249_s2 = scalar_lea.hbm %s325_s4, 16 }
 0x1ba   :  { %p250_p5 = scmp.ne.s32.totalorder %s325_s4, %s249_s2  ;;  %p253_p6 = scmp.lt.u32.totalorder %s249_s2, %s325_s4 }
 0x1bc   :  { %p255_p7 = pnand %p253_p6, %p250_p5 }
 0x1be   :  { %258 = shalt.err (!%p255_p7)
}
 0x1bf   :  { %202 = dma.vmem_to_hbm [thread:$0]  %s200_s25, 16, %s325_s4, [#allocation3]  }
 0x1c0   :  { %259 = dma.done.wait [#allocation3], 16  }
 0x1c1   :  { %260 = vsyncadd [#allocation3], 4294967280 }
 0x1c2   :  { %206 = vsyncpa [#allocation3], 1 }

</bundles_post_ra>
